<compile_context>
chip_gen: v5e
topology: v5e:2x2
jax: 0.10.0
libtpu: 0.0.40
codegen_flags: <defaults>
</compile_context>

<pallas_src>
import jax
import jax.numpy as jnp
from jax.experimental import pallas as pl
from jax.experimental.pallas import tpu as pltpu


def _cdiv(a, b):
    return -(-a // b)


def _make_kernel(rows, tile_rows, tiles_per_part, needs_mask):
    def kernel(x_ref, o_ref, acc_ref):
        c = pl.program_id(0)   # partition ("parallel" -> 2 TCs on v7x)
        i = pl.program_id(1)   # tile within partition (reduce axis)

        @pl.when(i == 0)
        def _init():
            acc_ref[...] = jnp.zeros_like(acc_ref)

        x = x_ref[...].astype(jnp.float32)

        if needs_mask:
            # Static-enabled only when the (partitioned) grid over-covers the
            # row count: zero out padded rows of the ragged last tile and any
            # fully-duplicated overflow tiles (their index_map is clamped).
            g = c * tiles_per_part + i                       # global tile idx
            valid = jnp.clip(rows - g * tile_rows, 0, tile_rows)
            rid = jax.lax.broadcasted_iota(jnp.int32, x.shape, 0)
            x = jnp.where(rid < valid, x, 0.0)

        # Per-tile sublane reduce into a tiny (1, W) f32 accumulator:
        # ~1 vld + 1 vadd per data vreg, no full-tile read-modify-write.
        acc_ref[...] += jnp.sum(x, axis=0, keepdims=True)

        @pl.when(i == pl.num_programs(1) - 1)
        def _finalize():
            # One cross-lane reduce per partition; replicate the scalar over an
            # (8, 128)-aligned output block.
            o_ref[0] = jnp.full((8, 128), jnp.sum(acc_ref[...]),
                                dtype=jnp.float32)

    return kernel


def area_loss(attn: jax.Array, *, target_tile_bytes: int = 4 << 20) -> jax.Array:
    """Pallas implementation of AreaLoss.forward.

    attn: array with >= 3 dims (e.g. NCHW). Returns float32 scalar equal to
    sum(attn) / (shape[0] * shape[1] * shape[2]) — last dim excluded, as in
    the PyTorch reference.
    """
    assert attn.ndim >= 3, "AreaLoss expects at least 3 dims"
    denom = attn.shape[0] * attn.shape[1] * attn.shape[2]
    inv_denom = 1.0 / float(denom)

    # ---- Zero-copy glue: collapse leading dims only (last dim unchanged) ----
    w = attn.shape[-1]
    rows = attn.size // w
    x2d = attn.reshape(rows, w)

    itemsize = jnp.dtype(attn.dtype).itemsize
    lane_pad = max(_cdiv(w, 128) * 128, 128)       # physical lane width in VMEM

    # ~target_tile_bytes per input buffer; row tile a multiple of 256 (safe for
    # any dtype's native sublane tiling).
    tile_rows = max(256, (target_tile_bytes // (lane_pad * itemsize)) // 256 * 256)
    if rows <= tile_rows:
        tile_rows = rows                            # single exact tile
    n_tiles = _cdiv(rows, tile_rows)

    # Megacore split only when there is enough work to amortize the extra
    # finalize / possible duplicate tile (on 1-TC chips it is just a serial
    # outer loop, so keep it off for small inputs).
    num_parts = 2 if n_tiles >= 8 else 1
    tiles_per_part = _cdiv(n_tiles, num_parts)
    covered_rows = num_parts * tiles_per_part * tile_rows
    needs_mask = covered_rows != rows

    if num_parts * tiles_per_part > n_tiles:
        # Overflow grid points re-read the last real tile; the kernel masks
        # them to zero via the global tile index.
        in_index = lambda c, i: (jnp.minimum(c * tiles_per_part + i, n_tiles - 1), 0)
    else:
        in_index = lambda c, i: (c * tiles_per_part + i, 0)

    tile_vmem = tile_rows * lane_pad * itemsize
    vmem_limit = int(min(48 << 20, max(16 << 20, 2 * tile_vmem + (4 << 20))))

    kernel = _make_kernel(rows, tile_rows, tiles_per_part, needs_mask)

    partials = pl.pallas_call(
        kernel,
        out_shape=jax.ShapeDtypeStruct((num_parts, 8, 128), jnp.float32),
        grid_spec=pltpu.PrefetchScalarGridSpec(
            num_scalar_prefetch=0,
            grid=(num_parts, tiles_per_part),
            in_specs=[pl.BlockSpec((tile_rows, w), in_index)],
            out_specs=pl.BlockSpec((1, 8, 128), lambda c, i: (c, 0, 0)),
            scratch_shapes=[pltpu.VMEM((1, w), jnp.float32)],
        ),
        compiler_params=pltpu.CompilerParams(
            dimension_semantics=("parallel", "arbitrary"),
            vmem_limit_bytes=vmem_limit,
        ),
        cost_estimate=pl.CostEstimate(
            flops=int(attn.size),
            transcendentals=0,
            bytes_accessed=int(attn.size * itemsize) + num_parts * 8 * 128 * 4,
        ),
    )(x2d)

    # Combine per-partition partials and normalize (tiny scalar ops).
    return jnp.sum(partials[:, 0, 0]) * inv_denom


def area_loss_ref(attn: jax.Array) -> jax.Array:
    # Pure-JAX reference for correctness checking.
    return jnp.sum(attn.astype(jnp.float32)) / (
        attn.shape[0] * attn.shape[1] * attn.shape[2]
    )


if __name__ == "__main__":
    key = jax.random.PRNGKey(0)
    k1, k2, k3 = jax.random.split(key, 3)

    # Small NCHW attention map (B=2, C=4, H=16, W=16): single exact tile.
    attn_small = jax.random.uniform(k1, (2, 4, 16, 16), dtype=jnp.float32)
    loss = jax.block_until_ready(area_loss(attn_small))
    ref = jax.block_until_ready(area_loss_ref(attn_small))
    assert jnp.allclose(loss, ref, rtol=1e-5, atol=1e-5), (loss, ref)

    # Larger map: multi-tile accumulation with exact coverage (no masking),
    # lane dim = 160 handled directly (no repack).
    attn_big = jax.random.uniform(k2, (4, 8, 256, 160), dtype=jnp.float32)
    loss_b = jax.block_until_ready(area_loss(attn_big))
    ref_b = jax.block_until_ready(area_loss_ref(attn_big))
    assert jnp.allclose(loss_b, ref_b, rtol=1e-5, atol=1e-5), (loss_b, ref_b)

    # Small shape with a tiny tile target: exercises the ragged-tail mask,
    # the 2-partition grid, and the clamped index_map (overflow tile).
    attn_rag = jax.random.uniform(k3, (2, 2, 513, 16), dtype=jnp.float32)
    loss_r = jax.block_until_ready(area_loss(attn_rag, target_tile_bytes=16 << 10))
    ref_r = jax.block_until_ready(area_loss_ref(attn_rag))
    assert jnp.allclose(loss_r, ref_r, rtol=1e-5, atol=1e-5), (loss_r, ref_r)

    print("KERNEL_OK")
</pallas_src>

<mosaic_0001>
module attributes {stable_mosaic.version = 11 : i64} {
  func.func @kernel(%arg0: i32, %arg1: i32, %arg2: memref<128x16xf32, #tpu.memory_space<vmem>>, %arg3: memref<1x8x128xf32, #tpu.memory_space<vmem>>, %arg4: memref<1x16xf32, #tpu.memory_space<vmem>>) attributes {dimension_semantics = [#tpu.dimension_semantics<parallel>, #tpu.dimension_semantics<arbitrary>], iteration_bounds = array<i64: 1, 1>, scalar_prefetch = 0 : i64, scratch_operands = 1 : i64, tpu.core_type = #tpu.core_type<tc>, window_params = [{transform_indices = @transform_0, window_bounds = array<i64: 128, 16>}, {transform_indices = @transform_1, window_bounds = array<i64: 1, 8, 128>}]} {
    %c0_i32 = arith.constant 0 : i32
    %0 = arith.cmpi eq, %arg1, %c0_i32 : i32
    %1 = arith.extui %0 : i1 to i32
    %c0_i32_0 = arith.constant 0 : i32
    %2 = arith.cmpi ne, %1, %c0_i32_0 : i32
    scf.if %2 {
      %cst_8 = arith.constant 0.000000e+00 : f32
      %12 = vector.broadcast %cst_8 : f32 to vector<1x16xf32>
      %c0_9 = arith.constant 0 : index
      %c0_10 = arith.constant 0 : index
      %13 = vector.load %arg4[%c0_9, %c0_10] : memref<1x16xf32, #tpu.memory_space<vmem>>, vector<1x16xf32>
      tpu.vector_store %arg4[%c0_9, %c0_10], %12 {strides = array<i32>} : memref<1x16xf32, #tpu.memory_space<vmem>>, vector<1x16xf32>,
    } else {
    }
    %c0 = arith.constant 0 : index
    %c0_1 = arith.constant 0 : index
    %3 = vector.load %arg2[%c0, %c0_1] : memref<128x16xf32, #tpu.memory_space<vmem>>, vector<128x16xf32>
    %c0_2 = arith.constant 0 : index
    %c0_3 = arith.constant 0 : index
    %4 = vector.load %arg4[%c0_2, %c0_3] : memref<1x16xf32, #tpu.memory_space<vmem>>, vector<1x16xf32>
    %cst = arith.constant dense<0.000000e+00> : vector<16xf32>
    %5 = vector.multi_reduction <add>, %3, %cst [0] : vector<128x16xf32> to vector<16xf32>
    %6 = vector.shape_cast %5 : vector<16xf32> to vector<1x16xf32>
    %7 = arith.addf %4, %6 : vector<1x16xf32>
    %c0_4 = arith.constant 0 : index
    %c0_5 = arith.constant 0 : index
    %8 = vector.load %arg4[%c0_4, %c0_5] : memref<1x16xf32, #tpu.memory_space<vmem>>, vector<1x16xf32>
    tpu.vector_store %arg4[%c0_4, %c0_5], %7 {strides = array<i32>} : memref<1x16xf32, #tpu.memory_space<vmem>>, vector<1x16xf32>,
    %c0_i32_6 = arith.constant 0 : i32
    %9 = arith.cmpi eq, %arg1, %c0_i32_6 : i32
    %10 = arith.extui %9 : i1 to i32
    %c0_i32_7 = arith.constant 0 : i32
    %11 = arith.cmpi ne, %10, %c0_i32_7 : i32
    scf.if %11 {
      %c0_8 = arith.constant 0 : index
      %c0_9 = arith.constant 0 : index
      %12 = vector.load %arg4[%c0_8, %c0_9] : memref<1x16xf32, #tpu.memory_space<vmem>>, vector<1x16xf32>
      %13 = vector.shape_cast %12 : vector<1x16xf32> to vector<1x1x16xf32>
      %cst_10 = arith.constant dense<0.000000e+00> : vector<1xf32>
      %14 = vector.multi_reduction <add>, %13, %cst_10 [1, 2] : vector<1x1x16xf32> to vector<1xf32>
      %15 = vector.shape_cast %14 : vector<1xf32> to vector<1x1x1xf32>
      %16 = vector.extract %15[0, 0, 0] : f32 from vector<1x1x1xf32>
      %17 = vector.broadcast %16 : f32 to vector<8x128xf32>
      %c0_11 = arith.constant 0 : index
      %c0_12 = arith.constant 0 : index
      %c0_13 = arith.constant 0 : index
      %18 = vector.load %arg3[%c0_11, %c0_12, %c0_13] : memref<1x8x128xf32, #tpu.memory_space<vmem>>, vector<1x8x128xf32>
      %19 = vector.shape_cast %18 : vector<1x8x128xf32> to vector<8x128xf32>
      %20 = vector.shape_cast %17 : vector<8x128xf32> to vector<1x8x128xf32>
      tpu.vector_store %arg3[%c0_11, %c0_12, %c0_13], %20 {strides = array<i32>} : memref<1x8x128xf32, #tpu.memory_space<vmem>>, vector<1x8x128xf32>,
    } else {
    }
    return
  }
  func.func @transform_0(%arg0: i32, %arg1: i32) -> (i32, i32) {
    %c1_i32 = arith.constant 1 : i32
    %0 = arith.muli %arg0, %c1_i32 : i32
    %1 = arith.addi %0, %arg1 : i32
    %c0_i32 = arith.constant 0 : i32
    %c0_i32_0 = arith.constant 0 : i32
    return %1, %c0_i32 : i32, i32
  }
  func.func @transform_1(%arg0: i32, %arg1: i32) -> (i32, i32, i32) {
    %c0_i32 = arith.constant 0 : i32
    %c0_i32_0 = arith.constant 0 : i32
    %c0_i32_1 = arith.constant 0 : i32
    return %arg0, %c0_i32, %c0_i32_0 : i32, i32, i32
  }
}

</mosaic_0001>

<bundles_post_ra>
// kernel: tpu_custom_call.1
= control target key start
LH: loop header
LB: loop body
LE: loop exit
PB: predicated region body
PF: predicated region fallthrough
CT: control target
= control target key end

     0   :  { %vm35_vm0 = vcmask 122880   ;;  %vm54_vm1 = vcmask 130048   ;;  %v163_v3 = vmov 0.0   ;;  %s245_s0 = inlined_call_operand.vmem [shape: f32[128,16], index: 0, kind: input, shape index: {}]   ;;  %s246_s1 = inlined_call_operand.hbm [shape: f32[1,8,128], index: 1, kind: output, shape index: {}]  }
   0x1   :  { %v37_v0 = vld [vmem:[%s245_s0] sm:$0xff]  ;;  %v38_v1 = vld [vmem:[%s245_s0 + $0x8] sm:$0xff]  ;;  %v39_v2 = vld [vmem:[%s245_s0 + $0x10] sm:$0xff]  ;;  %36 = vst.msk [vmem:[#allocation2] sm:$0x1] %vm35_vm0, %v163_v3 }
   0x2   :  { %v40_v4 = vld [vmem:[%s245_s0 + $0x18] sm:$0xff]  ;;  %v55_v5 = vsel %vm54_vm1, %v37_v0, 0.0  ;;  %v56_v6 = vsel %vm54_vm1, %v38_v1, 0.0  ;;  %v58_v7 = vsel %vm54_vm1, %v39_v2, 0.0  ;;  %v41_v8 = vld [vmem:[%s245_s0 + $0x20] sm:$0xff]  ;;  %v42_v11 = vld [vmem:[%s245_s0 + $0x28] sm:$0xff] }
   0x3   :  { %v57_v9 = vadd.f32 %v56_v6, %v55_v5  ;;  %v60_v10 = vsel %vm54_vm1, %v40_v4, 0.0 }
   0x5   :  { %v59_v12 = vadd.f32 %v58_v7, %v57_v9 }
   0x6   :  { %6 = vsyncpa [#allocation4], 0  ;;  %v62_v13 = vsel %vm54_vm1, %v41_v8, 0.0  ;;  %v43_v14 = vld [vmem:[%s245_s0 + $0x30] sm:$0xff]  ;;  %v64_v16 = vsel %vm54_vm1, %v42_v11, 0.0  ;;  %v44_v17 = vld [vmem:[%s245_s0 + $0x38] sm:$0xff] }
   0x7   :  { %v61_v15 = vadd.f32 %v60_v10, %v59_v12  ;;  %v66_v19 = vsel %vm54_vm1, %v43_v14, 0.0  ;;  %v45_v20 = vld [vmem:[%s245_s0 + $0x40] sm:$0xff]  ;;  %v68_v22 = vsel %vm54_vm1, %v44_v17, 0.0  ;;  %v46_v23 = vld [vmem:[%s245_s0 + $0x48] sm:$0xff]  ;;  %v47_v26 = vld [vmem:[%s245_s0 + $0x50] sm:$0xff]  ;;  %s118_s12 = sshll.u32 %s246_s1, 4  ;;  %s119_s12 = int_to_ptr.hbm [resolvable:$true] %s118_s12 }
   0x8   :  { %v70_v25 = vsel %vm54_vm1, %v45_v20, 0.0  ;;  %v72_v28 = vsel %vm54_vm1, %v46_v23, 0.0  ;;  %v48_v29 = vld [vmem:[%s245_s0 + $0x58] sm:$0xff]  ;;  %v74_v31 = vsel %vm54_vm1, %v47_v26, 0.0  ;;  %v49_v32 = vld [vmem:[%s245_s0 + $0x60] sm:$0xff]  ;;  %v50_v35 = vld [vmem:[%s245_s0 + $0x68] sm:$0xff] }
   0x9   :  { %v63_v18 = vadd.f32 %v62_v13, %v61_v15  ;;  %v76_v34 = vsel %vm54_vm1, %v48_v29, 0.0  ;;  %v78_v37 = vsel %vm54_vm1, %v49_v32, 0.0  ;;  %v51_v38 = vld [vmem:[%s245_s0 + $0x70] sm:$0xff]  ;;  %v80_v40 = vsel %vm54_vm1, %v50_v35, 0.0  ;;  %v52_v41 = vld [vmem:[%s245_s0 + $0x78] sm:$0xff]  ;;  %s164_s0 = smov [#allocation3]  }
   0xa   :  { %v82_v43 = vsel %vm54_vm1, %v51_v38, 0.0  ;;  %v84_v45 = vsel %vm54_vm1, %v52_v41, 0.0  ;;  %v53_v53 = vld [vmem:[#allocation2] sm:$0x1]  ;;  %s116_s9 = sshll.u32 %s164_s0, 4  ;;  %s117_s9 = int_to_ptr.vmem [resolvable:$true] %s116_s9 }
   0xb   :  { %v65_v21 = vadd.f32 %v64_v16, %v63_v18 }
   0xd   :  { %v67_v24 = vadd.f32 %v66_v19, %v65_v21 }
   0xf   :  { %v69_v27 = vadd.f32 %v68_v22, %v67_v24 }
  0x11   :  { %v71_v30 = vadd.f32 %v70_v25, %v69_v27 }
  0x13   :  { %v73_v33 = vadd.f32 %v72_v28, %v71_v30 }
  0x15   :  { %v75_v36 = vadd.f32 %v74_v31, %v73_v33 }
  0x17   :  { %v77_v39 = vadd.f32 %v76_v34, %v75_v36 }
  0x19   :  { %v79_v42 = vadd.f32 %v78_v37, %v77_v39 }
  0x1b   :  { %v81_v44 = vadd.f32 %v80_v40, %v79_v42 }
  0x1d   :  { %v83_v46 = vadd.f32 %v82_v43, %v81_v44 }
  0x1f   :  { %v85_v47 = vadd.f32 %v84_v45, %v83_v46 }
  0x21   :  { %v86_v48 = vrot.slane %v85_v47, 4 }
  0x23   :  { %v87_v49 = vadd.f32 %v86_v48, %v85_v47 }
  0x25   :  { %v88_v50 = vrot.slane %v87_v49, 2 }
  0x27   :  { %v89_v51 = vadd.f32 %v88_v50, %v87_v49 }
  0x29   :  { %v90_v52 = vrot.slane %v89_v51, 1 }
  0x2b   :  { %v91_v54 = vadd.f32 %v90_v52, %v89_v51 }
  0x2d   :  { %v92_v55 = vadd.f32 %v91_v54, %v53_v53 }
  0x2f   :  { %94 = vst.msk [vmem:[#allocation2] sm:$0x1] %vm35_vm0, %v92_v55 }
  0x36   :  { %v98_v56 = vld [vmem:[#allocation2] sm:$0x1] }
  0x37   :  { %v99_v57 = vsel %vm35_vm0, %v98_v56, 0.0 }
  0x38   :  { %100 = vadd.xlane.f32.xlu0 %v99_v57 }
  0xab   :  { %v101_v58 = vpop.xlane.xlu0 %100 }
  0xac   :  { %v102_v59 = vrot.slane %v101_v58, 4 }
  0xae   :  { %v103_v60 = vadd.f32 %v102_v59, %v101_v58 }
  0xb0   :  { %v104_v61 = vrot.slane %v103_v60, 2 }
  0xb2   :  { %v105_v62 = vadd.f32 %v104_v61, %v103_v60 }
  0xb4   :  { %v106_v63 = vrot.slane %v105_v62, 1 }
  0xb6   :  { %v107_v0 = vadd.f32 %v106_v63, %v105_v62 }
  0xb8   :  { %133 = vpush %v107_v0 }
  0xe9   :  { %s134_s13 = spop %133 }
  0xea   :  { %v109_v1 = vstv %s134_s13 }
  0xeb   :  { %110 = vst [vmem:[#allocation3] sm:$0xff] %v109_v1 }
  0xec   :  { %121 = dma.vmem_to_hbm [thread:$0]  %s117_s9, 128, %s119_s12, [#allocation4]  }
  0xed   :  { %161 = dma.done.wait [#allocation4], 128  }
  0xee   :  { %162 = vsyncadd [#allocation4], 4294967168 }
  0xef   :  { %126 = vsyncpa [#allocation4], 1 }

</bundles_post_ra>
